<compile_context>
chip_gen: v5e
topology: v5e:2x2
jax: 0.10.0
libtpu: 0.0.40
codegen_flags: <defaults>
</compile_context>

<pallas_src>
import math

import jax
import jax.numpy as jnp
from jax.experimental import pallas as pl
from jax.experimental.pallas import tpu as pltpu

_LANE = 128


def _leaky_relu(x, negative_slope=0.2):
    # max(x, 0.2*x) == LeakyReLU(0.2) and keeps padded zero columns exactly 0.
    return jnp.maximum(x, negative_slope * x)


def generator_kernel(z_ref,
                     w1, b1, w2, b2, w3, b3, w4, b4, w5, b5, w6, b6,
                     out_ref):
    # One batch tile; all weights (bf16) / biases (f32) resident in VMEM.
    def dot_bf16(h, w_ref):
        # bf16 x bf16 MXU matmul, f32 accumulation.
        return jnp.dot(h.astype(jnp.bfloat16), w_ref[...],
                       preferred_element_type=jnp.float32)

    h = z_ref[...].astype(jnp.float32)
    h = _leaky_relu(dot_bf16(h, w1) + b1[...])
    h = _leaky_relu(dot_bf16(h, w2) + b2[...])
    h = _leaky_relu(dot_bf16(h, w3) + b3[...])
    h = _leaky_relu(dot_bf16(h, w4) + b4[...])
    h = _leaky_relu(dot_bf16(h, w5) + b5[...])
    h = dot_bf16(h, w6) + b6[...]            # last layer: no activation
    out_ref[...] = h.astype(out_ref.dtype)


def _pad_params_for_lanes(params, lane=_LANE):
    """Zero-pad feature dims so activations / the output block are lane-dense.

    Hidden out-features < 128 are padded up to 128; the LAST layer's
    out-features are padded up to the next multiple of 128 (sliced off by the
    wrapper).  Padded columns have zero bias -> stay 0 through LeakyReLU ->
    contribute nothing to the next layer (whose extra weight rows are zero).
    """
    padded = []
    prev_pad = 0
    for i, (w, b) in enumerate(params):
        in_f, out_f = w.shape
        if prev_pad:
            w = jnp.concatenate([w, jnp.zeros((prev_pad, out_f), w.dtype)], axis=0)
        is_last = (i == len(params) - 1)
        if is_last:
            out_pad = (-out_f) % lane            # lane-dense output writeback
        else:
            out_pad = (lane - out_f) if out_f < lane else 0
        if out_pad:
            w = jnp.concatenate([w, jnp.zeros((w.shape[0], out_pad), w.dtype)], axis=1)
            b = jnp.concatenate([b, jnp.zeros((1, out_pad), b.dtype)], axis=1)
        padded.append((w, b))
        prev_pad = out_pad
    return padded


def _default_batch_tile(B, target=1024):
    """Batch tile choice.

    Small B -> single grid step (no per-step overhead; v5e/v6e have 1 TC so a
    forced split buys nothing).  Large B -> ~`target`-row tiles (multiple of
    8, dividing B), preferring an even number of grid steps for v7x's 2 TCs.
    """
    if B % 8 != 0 or B <= target:
        return B
    tile = max(8, (min(target, B) // 8) * 8)
    while B % tile != 0:
        tile -= 8
    steps = B // tile
    if steps % 2 == 1:                       # prefer an even grid (v7x megacore)
        t2 = tile - 8
        while t2 >= 8:
            if B % t2 == 0 and (B // t2) % 2 == 0:
                tile = t2
                break
            t2 -= 8
    return tile


def generator_forward(z, params, *, batch_tile=None, out_dtype=jnp.float32,
                      vmem_limit_bytes=None):
    """params: list of (W, b) with W shaped (in, out), b shaped (1, out)."""
    B, latent_dim = z.shape
    spectrum_dim = params[-1][0].shape[1]

    if batch_tile is None:
        batch_tile = _default_batch_tile(B)
    assert B % batch_tile == 0, "batch_tile must divide batch"
    assert batch_tile == B or batch_tile % 8 == 0, \
        "batch_tile must be a multiple of 8 (f32 sublane) or equal to batch"

    # Lane-dense padding (done once, outside the grid); weights -> bf16,
    # biases stay f32 (added after the f32-accumulated matmul).
    padded_params = _pad_params_for_lanes(params)
    spectrum_pad = padded_params[-1][0].shape[1]
    flat_params = []
    for w, b in padded_params:
        flat_params.extend([w.astype(jnp.bfloat16), b.astype(jnp.float32)])

    # Weights/biases: untiled, VMEM-resident for the whole grid.
    param_specs = [pl.BlockSpec(memory_space=pltpu.MemorySpace.VMEM)
                   for _ in flat_params]

    # Raise the scoped VMEM limit only when the footprint needs it (v5e's
    # default is 16 MiB); cap well under v7x's 64 MiB physical VMEM.
    if vmem_limit_bytes is None:
        param_bytes = sum(int(p.size) * p.dtype.itemsize for p in flat_params)
        io_bytes = (2 * batch_tile * latent_dim * 4
                    + 2 * batch_tile * spectrum_pad * jnp.dtype(out_dtype).itemsize)
        scratch_bytes = 8 * batch_tile * 256 * 4   # generous headroom for live intermediates
        est = param_bytes + io_bytes + scratch_bytes
        if est > 12 * 1024 * 1024:
            vmem_limit_bytes = min(int(est * 3 // 2), 48 * 1024 * 1024)

    grid = (B // batch_tile,)
    compiler_params = pltpu.CompilerParams(
        dimension_semantics=("parallel",),
        vmem_limit_bytes=vmem_limit_bytes,
    )

    out = pl.pallas_call(
        generator_kernel,
        out_shape=jax.ShapeDtypeStruct((B, spectrum_pad), out_dtype),
        grid_spec=pltpu.PrefetchScalarGridSpec(
            num_scalar_prefetch=0,
            grid=grid,
            in_specs=[pl.BlockSpec((batch_tile, latent_dim), lambda i: (i, 0))]
                     + param_specs,
            out_specs=pl.BlockSpec((batch_tile, spectrum_pad), lambda i: (i, 0)),
        ),
        compiler_params=compiler_params,
    )(z, *flat_params)

    if spectrum_pad != spectrum_dim:
        out = out[:, :spectrum_dim]
    return out


def init_generator_params(key, latent_dim, spectrum_dim):
    """Deterministic init mirroring nn.Linear's default U(-1/sqrt(fan_in), ...)."""
    dims = [latent_dim, 10, 20, 40, 80, 160, spectrum_dim]
    params = []
    for i in range(len(dims) - 1):
        fan_in, fan_out = dims[i], dims[i + 1]
        key, kw, kb = jax.random.split(key, 3)
        bound = 1.0 / math.sqrt(fan_in)
        w = jax.random.uniform(kw, (fan_in, fan_out), jnp.float32, -bound, bound)
        b = jax.random.uniform(kb, (1, fan_out), jnp.float32, -bound, bound)
        params.append((w, b))
    return params


def generator_reference_f32(z, params):
    h = z
    for i, (w, b) in enumerate(params):
        h = h @ w + b
        if i != len(params) - 1:
            h = jnp.maximum(h, 0.2 * h)
    return h


def generator_reference_bf16(z, params):
    # Mirrors the kernel's numerics: bf16 matmul operands, f32 accumulation,
    # f32 bias-add / activation.
    h = z.astype(jnp.float32)
    for i, (w, b) in enumerate(params):
        h = jnp.dot(h.astype(jnp.bfloat16), w.astype(jnp.bfloat16),
                    preferred_element_type=jnp.float32) + b
        if i != len(params) - 1:
            h = jnp.maximum(h, 0.2 * h)
    return h


if __name__ == "__main__":
    latent_dim = 16
    spectrum_dim = 256
    batch = 64          # small demo; single grid step (no forced split on 1-TC chips)

    key = jax.random.PRNGKey(0)
    key, kz = jax.random.split(key)
    z = jax.random.normal(kz, (batch, latent_dim), jnp.float32)

    params = init_generator_params(key, latent_dim, spectrum_dim)

    out = generator_forward(z, params)           # f32 output (module semantics)
    out = jax.block_until_ready(out)
    assert out.shape == (batch, spectrum_dim)

    # Tight check against a reference using the same bf16-operand numerics.
    ref_bf16 = generator_reference_bf16(z, params)
    assert jnp.allclose(out, ref_bf16, atol=2e-3, rtol=2e-3), \
        f"max abs err vs bf16 ref {jnp.max(jnp.abs(out - ref_bf16))}"

    # Loose check against the pure-f32 PyTorch-equivalent math (expected
    # bf16-operand precision loss only).
    ref_f32 = generator_reference_f32(z, params)
    assert jnp.allclose(out, ref_f32, atol=5e-2, rtol=5e-2), \
        f"max abs err vs f32 ref {jnp.max(jnp.abs(out - ref_f32))}"

    print("KERNEL_OK")
</pallas_src>

<mosaic_0001>
module attributes {stable_mosaic.version = 11 : i64} {
  func.func @generator_kernel(%arg0: i32, %arg1: memref<64x16xf32, #tpu.memory_space<vmem>>, %arg2: memref<16x128xbf16, #tpu.memory_space<vmem>>, %arg3: memref<1x128xf32, #tpu.memory_space<vmem>>, %arg4: memref<128x128xbf16, #tpu.memory_space<vmem>>, %arg5: memref<1x128xf32, #tpu.memory_space<vmem>>, %arg6: memref<128x128xbf16, #tpu.memory_space<vmem>>, %arg7: memref<1x128xf32, #tpu.memory_space<vmem>>, %arg8: memref<128x128xbf16, #tpu.memory_space<vmem>>, %arg9: memref<1x128xf32, #tpu.memory_space<vmem>>, %arg10: memref<128x160xbf16, #tpu.memory_space<vmem>>, %arg11: memref<1x160xf32, #tpu.memory_space<vmem>>, %arg12: memref<160x256xbf16, #tpu.memory_space<vmem>>, %arg13: memref<1x256xf32, #tpu.memory_space<vmem>>, %arg14: memref<64x256xf32, #tpu.memory_space<vmem>>) attributes {dimension_semantics = [#tpu.dimension_semantics<parallel>], iteration_bounds = array<i64: 1>, scalar_prefetch = 0 : i64, scratch_operands = 0 : i64, tpu.core_type = #tpu.core_type<tc>, window_params = [{transform_indices = @transform_0, window_bounds = array<i64: 64, 16>}, {pipeline_mode = #tpu.pipeline_mode<synchronous>, transform_indices = @transform_1, window_bounds = array<i64: 16, 128>}, {pipeline_mode = #tpu.pipeline_mode<synchronous>, transform_indices = @transform_2, window_bounds = array<i64: 1, 128>}, {pipeline_mode = #tpu.pipeline_mode<synchronous>, transform_indices = @transform_3, window_bounds = array<i64: 128, 128>}, {pipeline_mode = #tpu.pipeline_mode<synchronous>, transform_indices = @transform_4, window_bounds = array<i64: 1, 128>}, {pipeline_mode = #tpu.pipeline_mode<synchronous>, transform_indices = @transform_5, window_bounds = array<i64: 128, 128>}, {pipeline_mode = #tpu.pipeline_mode<synchronous>, transform_indices = @transform_6, window_bounds = array<i64: 1, 128>}, {pipeline_mode = #tpu.pipeline_mode<synchronous>, transform_indices = @transform_7, window_bounds = array<i64: 128, 128>}, {pipeline_mode = #tpu.pipeline_mode<synchronous>, transform_indices = @transform_8, window_bounds = array<i64: 1, 128>}, {pipeline_mode = #tpu.pipeline_mode<synchronous>, transform_indices = @transform_9, window_bounds = array<i64: 128, 160>}, {pipeline_mode = #tpu.pipeline_mode<synchronous>, transform_indices = @transform_10, window_bounds = array<i64: 1, 160>}, {pipeline_mode = #tpu.pipeline_mode<synchronous>, transform_indices = @transform_11, window_bounds = array<i64: 160, 256>}, {pipeline_mode = #tpu.pipeline_mode<synchronous>, transform_indices = @transform_12, window_bounds = array<i64: 1, 256>}, {transform_indices = @transform_13, window_bounds = array<i64: 64, 256>}]} {
    %c0 = arith.constant 0 : index
    %c0_0 = arith.constant 0 : index
    %0 = vector.load %arg1[%c0, %c0_0] : memref<64x16xf32, #tpu.memory_space<vmem>>, vector<64x16xf32>
    %1 = arith.truncf %0 : vector<64x16xf32> to vector<64x16xbf16>
    %c0_1 = arith.constant 0 : index
    %c0_2 = arith.constant 0 : index
    %2 = vector.load %arg2[%c0_1, %c0_2] : memref<16x128xbf16, #tpu.memory_space<vmem>>, vector<16x128xbf16>
    %cst = arith.constant dense<0.000000e+00> : vector<64x128xf32>
    %3 = tpu.matmul %1, %2, %cst {dimension_numbers = #tpu.dot_dimension_numbers<[1], [0], [0], [1], [0, 0, 1, 1], [], []>} : vector<64x16xbf16>, vector<16x128xbf16>, vector<64x128xf32> -> vector<64x128xf32>
    %c0_3 = arith.constant 0 : index
    %c0_4 = arith.constant 0 : index
    %4 = vector.load %arg3[%c0_3, %c0_4] : memref<1x128xf32, #tpu.memory_space<vmem>>, vector<1x128xf32>
    %5 = vector.broadcast %4 : vector<1x128xf32> to vector<64x128xf32>
    %6 = arith.addf %3, %5 : vector<64x128xf32>
    %cst_5 = arith.constant 2.000000e-01 : f32
    %7 = vector.broadcast %cst_5 : f32 to vector<64x128xf32>
    %8 = arith.mulf %7, %6 : vector<64x128xf32>
    %9 = arith.maximumf %6, %8 : vector<64x128xf32>
    %10 = arith.truncf %9 : vector<64x128xf32> to vector<64x128xbf16>
    %c0_6 = arith.constant 0 : index
    %c0_7 = arith.constant 0 : index
    %11 = vector.load %arg4[%c0_6, %c0_7] : memref<128x128xbf16, #tpu.memory_space<vmem>>, vector<128x128xbf16>
    %cst_8 = arith.constant dense<0.000000e+00> : vector<64x128xf32>
    %12 = tpu.matmul %10, %11, %cst_8 {dimension_numbers = #tpu.dot_dimension_numbers<[1], [0], [0], [1], [0, 0, 1, 1], [], []>} : vector<64x128xbf16>, vector<128x128xbf16>, vector<64x128xf32> -> vector<64x128xf32>
    %c0_9 = arith.constant 0 : index
    %c0_10 = arith.constant 0 : index
    %13 = vector.load %arg5[%c0_9, %c0_10] : memref<1x128xf32, #tpu.memory_space<vmem>>, vector<1x128xf32>
    %14 = vector.broadcast %13 : vector<1x128xf32> to vector<64x128xf32>
    %15 = arith.addf %12, %14 : vector<64x128xf32>
    %cst_11 = arith.constant 2.000000e-01 : f32
    %16 = vector.broadcast %cst_11 : f32 to vector<64x128xf32>
    %17 = arith.mulf %16, %15 : vector<64x128xf32>
    %18 = arith.maximumf %15, %17 : vector<64x128xf32>
    %19 = arith.truncf %18 : vector<64x128xf32> to vector<64x128xbf16>
    %c0_12 = arith.constant 0 : index
    %c0_13 = arith.constant 0 : index
    %20 = vector.load %arg6[%c0_12, %c0_13] : memref<128x128xbf16, #tpu.memory_space<vmem>>, vector<128x128xbf16>
    %cst_14 = arith.constant dense<0.000000e+00> : vector<64x128xf32>
    %21 = tpu.matmul %19, %20, %cst_14 {dimension_numbers = #tpu.dot_dimension_numbers<[1], [0], [0], [1], [0, 0, 1, 1], [], []>} : vector<64x128xbf16>, vector<128x128xbf16>, vector<64x128xf32> -> vector<64x128xf32>
    %c0_15 = arith.constant 0 : index
    %c0_16 = arith.constant 0 : index
    %22 = vector.load %arg7[%c0_15, %c0_16] : memref<1x128xf32, #tpu.memory_space<vmem>>, vector<1x128xf32>
    %23 = vector.broadcast %22 : vector<1x128xf32> to vector<64x128xf32>
    %24 = arith.addf %21, %23 : vector<64x128xf32>
    %cst_17 = arith.constant 2.000000e-01 : f32
    %25 = vector.broadcast %cst_17 : f32 to vector<64x128xf32>
    %26 = arith.mulf %25, %24 : vector<64x128xf32>
    %27 = arith.maximumf %24, %26 : vector<64x128xf32>
    %28 = arith.truncf %27 : vector<64x128xf32> to vector<64x128xbf16>
    %c0_18 = arith.constant 0 : index
    %c0_19 = arith.constant 0 : index
    %29 = vector.load %arg8[%c0_18, %c0_19] : memref<128x128xbf16, #tpu.memory_space<vmem>>, vector<128x128xbf16>
    %cst_20 = arith.constant dense<0.000000e+00> : vector<64x128xf32>
    %30 = tpu.matmul %28, %29, %cst_20 {dimension_numbers = #tpu.dot_dimension_numbers<[1], [0], [0], [1], [0, 0, 1, 1], [], []>} : vector<64x128xbf16>, vector<128x128xbf16>, vector<64x128xf32> -> vector<64x128xf32>
    %c0_21 = arith.constant 0 : index
    %c0_22 = arith.constant 0 : index
    %31 = vector.load %arg9[%c0_21, %c0_22] : memref<1x128xf32, #tpu.memory_space<vmem>>, vector<1x128xf32>
    %32 = vector.broadcast %31 : vector<1x128xf32> to vector<64x128xf32>
    %33 = arith.addf %30, %32 : vector<64x128xf32>
    %cst_23 = arith.constant 2.000000e-01 : f32
    %34 = vector.broadcast %cst_23 : f32 to vector<64x128xf32>
    %35 = arith.mulf %34, %33 : vector<64x128xf32>
    %36 = arith.maximumf %33, %35 : vector<64x128xf32>
    %37 = arith.truncf %36 : vector<64x128xf32> to vector<64x128xbf16>
    %c0_24 = arith.constant 0 : index
    %c0_25 = arith.constant 0 : index
    %38 = vector.load %arg10[%c0_24, %c0_25] : memref<128x160xbf16, #tpu.memory_space<vmem>>, vector<128x160xbf16>
    %cst_26 = arith.constant dense<0.000000e+00> : vector<64x160xf32>
    %39 = tpu.matmul %37, %38, %cst_26 {dimension_numbers = #tpu.dot_dimension_numbers<[1], [0], [0], [1], [0, 0, 1, 1], [], []>} : vector<64x128xbf16>, vector<128x160xbf16>, vector<64x160xf32> -> vector<64x160xf32>
    %c0_27 = arith.constant 0 : index
    %c0_28 = arith.constant 0 : index
    %40 = vector.load %arg11[%c0_27, %c0_28] : memref<1x160xf32, #tpu.memory_space<vmem>>, vector<1x160xf32>
    %41 = vector.broadcast %40 : vector<1x160xf32> to vector<64x160xf32>
    %42 = arith.addf %39, %41 : vector<64x160xf32>
    %cst_29 = arith.constant 2.000000e-01 : f32
    %43 = vector.broadcast %cst_29 : f32 to vector<64x160xf32>
    %44 = arith.mulf %43, %42 : vector<64x160xf32>
    %45 = arith.maximumf %42, %44 : vector<64x160xf32>
    %46 = arith.truncf %45 : vector<64x160xf32> to vector<64x160xbf16>
    %c0_30 = arith.constant 0 : index
    %c0_31 = arith.constant 0 : index
    %47 = vector.load %arg12[%c0_30, %c0_31] : memref<160x256xbf16, #tpu.memory_space<vmem>>, vector<160x256xbf16>
    %cst_32 = arith.constant dense<0.000000e+00> : vector<64x256xf32>
    %48 = tpu.matmul %46, %47, %cst_32 {dimension_numbers = #tpu.dot_dimension_numbers<[1], [0], [0], [1], [0, 0, 1, 1], [], []>} : vector<64x160xbf16>, vector<160x256xbf16>, vector<64x256xf32> -> vector<64x256xf32>
    %c0_33 = arith.constant 0 : index
    %c0_34 = arith.constant 0 : index
    %49 = vector.load %arg13[%c0_33, %c0_34] : memref<1x256xf32, #tpu.memory_space<vmem>>, vector<1x256xf32>
    %50 = vector.broadcast %49 : vector<1x256xf32> to vector<64x256xf32>
    %51 = arith.addf %48, %50 : vector<64x256xf32>
    %c0_35 = arith.constant 0 : index
    %c0_36 = arith.constant 0 : index
    %52 = vector.load %arg14[%c0_35, %c0_36] : memref<64x256xf32, #tpu.memory_space<vmem>>, vector<64x256xf32>
    tpu.vector_store %arg14[%c0_35, %c0_36], %51 {strides = array<i32>} : memref<64x256xf32, #tpu.memory_space<vmem>>, vector<64x256xf32>,
    return
  }
  func.func @transform_0(%arg0: i32) -> (i32, i32) {
    %c0_i32 = arith.constant 0 : i32
    %c0_i32_0 = arith.constant 0 : i32
    return %arg0, %c0_i32 : i32, i32
  }
  func.func @transform_1(%arg0: i32) -> (i32, i32) {
    %c0_i32 = arith.constant 0 : i32
    %c0_i32_0 = arith.constant 0 : i32
    %c0_i32_1 = arith.constant 0 : i32
    return %c0_i32, %c0_i32_0 : i32, i32
  }
  func.func @transform_2(%arg0: i32) -> (i32, i32) {
    %c0_i32 = arith.constant 0 : i32
    %c0_i32_0 = arith.constant 0 : i32
    %c0_i32_1 = arith.constant 0 : i32
    return %c0_i32, %c0_i32_0 : i32, i32
  }
  func.func @transform_3(%arg0: i32) -> (i32, i32) {
    %c0_i32 = arith.constant 0 : i32
    %c0_i32_0 = arith.constant 0 : i32
    %c0_i32_1 = arith.constant 0 : i32
    return %c0_i32, %c0_i32_0 : i32, i32
  }
  func.func @transform_4(%arg0: i32) -> (i32, i32) {
    %c0_i32 = arith.constant 0 : i32
    %c0_i32_0 = arith.constant 0 : i32
    %c0_i32_1 = arith.constant 0 : i32
    return %c0_i32, %c0_i32_0 : i32, i32
  }
  func.func @transform_5(%arg0: i32) -> (i32, i32) {
    %c0_i32 = arith.constant 0 : i32
    %c0_i32_0 = arith.constant 0 : i32
    %c0_i32_1 = arith.constant 0 : i32
    return %c0_i32, %c0_i32_0 : i32, i32
  }
  func.func @transform_6(%arg0: i32) -> (i32, i32) {
    %c0_i32 = arith.constant 0 : i32
    %c0_i32_0 = arith.constant 0 : i32
    %c0_i32_1 = arith.constant 0 : i32
    return %c0_i32, %c0_i32_0 : i32, i32
  }
  func.func @transform_7(%arg0: i32) -> (i32, i32) {
    %c0_i32 = arith.constant 0 : i32
    %c0_i32_0 = arith.constant 0 : i32
    %c0_i32_1 = arith.constant 0 : i32
    return %c0_i32, %c0_i32_0 : i32, i32
  }
  func.func @transform_8(%arg0: i32) -> (i32, i32) {
    %c0_i32 = arith.constant 0 : i32
    %c0_i32_0 = arith.constant 0 : i32
    %c0_i32_1 = arith.constant 0 : i32
    return %c0_i32, %c0_i32_0 : i32, i32
  }
  func.func @transform_9(%arg0: i32) -> (i32, i32) {
    %c0_i32 = arith.constant 0 : i32
    %c0_i32_0 = arith.constant 0 : i32
    %c0_i32_1 = arith.constant 0 : i32
    return %c0_i32, %c0_i32_0 : i32, i32
  }
  func.func @transform_10(%arg0: i32) -> (i32, i32) {
    %c0_i32 = arith.constant 0 : i32
    %c0_i32_0 = arith.constant 0 : i32
    %c0_i32_1 = arith.constant 0 : i32
    return %c0_i32, %c0_i32_0 : i32, i32
  }
  func.func @transform_11(%arg0: i32) -> (i32, i32) {
    %c0_i32 = arith.constant 0 : i32
    %c0_i32_0 = arith.constant 0 : i32
    %c0_i32_1 = arith.constant 0 : i32
    return %c0_i32, %c0_i32_0 : i32, i32
  }
  func.func @transform_12(%arg0: i32) -> (i32, i32) {
    %c0_i32 = arith.constant 0 : i32
    %c0_i32_0 = arith.constant 0 : i32
    %c0_i32_1 = arith.constant 0 : i32
    return %c0_i32, %c0_i32_0 : i32, i32
  }
  func.func @transform_13(%arg0: i32) -> (i32, i32) {
    %c0_i32 = arith.constant 0 : i32
    %c0_i32_0 = arith.constant 0 : i32
    return %arg0, %c0_i32 : i32, i32
  }
}

</mosaic_0001>

<bundles_post_ra>
// kernel: tpu_custom_call.1
= control target key start
LH: loop header
LB: loop body
LE: loop exit
PB: predicated region body
PF: predicated region fallthrough
CT: control target
= control target key end

     0   :  { %18 = vsyncpa [#allocation3], 0  ;;  %s1884_s0 = inlined_call_operand.vmem [shape: f32[64,16], index: 0, kind: input, shape index: {}]   ;;  %s1885_s1 = inlined_call_operand.vmem [shape: bf16[16,128], index: 1, kind: input, shape index: {}]   ;;  %s1886_s2 = inlined_call_operand.vmem [shape: f32[1,128], index: 2, kind: input, shape index: {}]   ;;  %s1887_s3 = inlined_call_operand.hbm [shape: bf16[128,128], index: 3, kind: input, shape index: {}]   ;;  %s1888_s4 = inlined_call_operand.vmem [shape: f32[1,128], index: 4, kind: input, shape index: {}]   ;;  %s1889_s5 = inlined_call_operand.hbm [shape: bf16[128,128], index: 5, kind: input, shape index: {}]   ;;  %s1890_s6 = inlined_call_operand.vmem [shape: f32[1,128], index: 6, kind: input, shape index: {}]   ;;  %s1891_s7 = inlined_call_operand.hbm [shape: bf16[128,128], index: 7, kind: input, shape index: {}]   ;;  %s1892_s8 = inlined_call_operand.vmem [shape: f32[1,128], index: 8, kind: input, shape index: {}]   ;;  %s1893_s9 = inlined_call_operand.vmem [shape: bf16[128,160], index: 9, kind: input, shape index: {}]   ;;  %s1894_s10 = inlined_call_operand.vmem [shape: f32[1,160], index: 10, kind: input, shape index: {}]   ;;  %s1895_s11 = inlined_call_operand.vmem [shape: bf16[160,256], index: 11, kind: input, shape index: {}]   ;;  %s1896_s12 = inlined_call_operand.vmem [shape: f32[1,256], index: 12, kind: input, shape index: {}]   ;;  %s1897_s13 = inlined_call_operand.hbm [shape: f32[64,256], index: 13, kind: output, shape index: {}]  }
   0x1   :  { %19 = vsyncpa [#allocation6], 0 }
   0x2   :  { %20 = vsyncpa [#allocation4], 0  ;;  %s46_s27 = sshll.u32 %s1889_s5, 4  ;;  %s1461_s28 = smov [#allocation5]   ;;  %s47_s27 = int_to_ptr.hbm [resolvable:$true] %s46_s27 }
   0x3   :  { %s48_s29 = sshll.u32 %s1461_s28, 4  ;;  %s31_s15 = sshll.u32 %s1887_s3, 4  ;;  %s49_s29 = int_to_ptr.vmem [resolvable:$true] %s48_s29  ;;  %s32_s15 = int_to_ptr.hbm [resolvable:$true] %s31_s15 }
   0x4   :  { %s1462_s16 = smov 64   ;;  %s1463_s17 = smov 4  }
   0x5   :  { %54 = dma.hbm_to_vmem [thread:$0]  %s47_s27, 1024, %s49_s29, [#allocation6], %s1462_s16, %s1462_s16, %s1463_s17  }
   0x6   :  { %s1464_s18 = smov [#allocation2]   ;;  %s61_s22 = sshll.u32 %s1891_s7, 4  ;;  %s62_s22 = int_to_ptr.hbm [resolvable:$true] %s61_s22 }
   0x7   :  { %s33_s19 = sshll.u32 %s1464_s18, 4  ;;  %s1465_s5 = smov [#allocation7]   ;;  %s34_s19 = int_to_ptr.vmem [resolvable:$true] %s33_s19 }
   0x8   :  { %39 = dma.hbm_to_vmem [thread:$0]  %s32_s15, 1024, %s34_s19, [#allocation3], %s1462_s16, %s1462_s16, %s1463_s17  }
   0x9   :  { %s63_s23 = sshll.u32 %s1465_s5, 4  ;;  %s64_s23 = int_to_ptr.vmem [resolvable:$true] %s63_s23 }
   0xa   :  { %69 = dma.hbm_to_vmem [thread:$0]  %s62_s22, 1024, %s64_s23, [#allocation6], %s1462_s16, %s1462_s16, %s1463_s17  }
   0xb   :  { %1455 = dma.done.wait [#allocation3], 1024  }
   0xc   :  { %1456 = vsyncadd [#allocation3], 4294966272 }
   0xd   :  { %1457 = dma.done.wait [#allocation6], 2048  }
   0xe   :  { %1458 = vsyncadd [#allocation6], 4294965248  ;;  %v1277_v0 = vld [vmem:[%s1885_s1] sm:$0xff]  ;;  %v94_v2 = vld [vmem:[%s1884_s0 + $0x8] sm:$0xff]  ;;  %vm117_vm0 = vcmask 130048   ;;  %vm856_vm1 = vcmask 261120  }
   0xf   :  { %v93_v1 = vld [vmem:[%s1884_s0] sm:$0xff]  ;;  %v98_v5 = vld [vmem:[%s1884_s0 + $0x28] sm:$0xff]  ;;  %137 = vmatpush.bf16.msra.mxu0 %v1277_v0  ;;  %1338 = vmatpush.bf16.msra.mxu3 %v1277_v0  ;;  %v1285_v7 = vld [vmem:[#allocation2 + $0x38] sm:$0xff]  ;;  %s1007_s21 = sshll.u32 %s1897_s13, 4  ;;  %s1468_s22 = smov 16   ;;  %s1008_s21 = int_to_ptr.hbm [resolvable:$true] %s1007_s21 }
  0x10   :  { %v101_v3 = vpack.c.bf16 %v94_v2, %v93_v1  ;;  %v97_v4 = vld [vmem:[%s1884_s0 + $0x20] sm:$0xff]  ;;  %247 = vmatpush.bf16.msra.mxu1 %v1285_v7  ;;  %v1284_v8 = vld [vmem:[#allocation2 + $0x30] sm:$0xff]  ;;  %1339 = vmatpush.bf16.msra.mxu2 %v1285_v7  ;;  %v1283_v9 = vld [vmem:[#allocation2 + $0x28] sm:$0xff] }
  0x11   :  { %v103_v6 = vpack.c.bf16 %v98_v5, %v97_v4  ;;  %v95_v10 = vld [vmem:[%s1884_s0 + $0x10] sm:$0xff]  ;;  %v96_v11 = vld [vmem:[%s1884_s0 + $0x18] sm:$0xff]  ;;  %v1282_v14 = vld [vmem:[#allocation2 + $0x20] sm:$0xff] }
  0x12   :  { %1025 = vmatmul.msk.bf16.vlgmr.msra.gmra.mxu0 %vm117_vm0, %v101_v3  ;;  %v99_v12 = vld [vmem:[%s1884_s0 + $0x30] sm:$0xff]  ;;  %v100_v13 = vld [vmem:[%s1884_s0 + $0x38] sm:$0xff]  ;;  %v102_v15 = vpack.c.bf16 %v96_v11, %v95_v10  ;;  %v1279_v19 = vld [vmem:[#allocation2 + $0x8] sm:$0xff]  ;;  %s1467_s0 = smov 256  }
  0x13   :  { %1027 = vmatmul.msk.bf16.vlgmr.msra.gmra.mxu3 %vm117_vm0, %v103_v6  ;;  %v104_v16 = vpack.c.bf16 %v100_v13, %v99_v12  ;;  %v1281_v17 = vld [vmem:[#allocation2 + $0x18] sm:$0xff]  ;;  %v1280_v18 = vld [vmem:[#allocation2 + $0x10] sm:$0xff]  ;;  %v1278_v20 = vld [vmem:[#allocation2] sm:$0xff] }
  0x14   :  { %248 = vmatpush.bf16.msra.mxu1 %v1284_v8  ;;  %1340 = vmatpush.bf16.msra.mxu2 %v1284_v8  ;;  %v1355_v22 = vld [vmem:[%s1886_s2] ss:$0 sm:$0xff]  ;;  %v1293_v25 = vld [vmem:[#allocation5 + $0x38] sm:$0xff]  ;;  %v1292_v30 = vld [vmem:[#allocation5 + $0x30] sm:$0xff] }
  0x15   :  { %v1291_v35 = vld [vmem:[#allocation5 + $0x28] sm:$0xff]  ;;  %v1290_v42 = vld [vmem:[#allocation5 + $0x20] sm:$0xff]  ;;  %v1289_v62 = vld [vmem:[#allocation5 + $0x18] sm:$0xff] }
  0x16   :  { %v1288_v63 = vld [vmem:[#allocation5 + $0x10] sm:$0xff]  ;;  %v1287_v0 = vld [vmem:[#allocation5 + $0x8] sm:$0xff]  ;;  %v1286_v1 = vld [vmem:[#allocation5] sm:$0xff] }
  0x17   :  { %v1356_v3 = vld [vmem:[%s1888_s4] ss:$0 sm:$0xff] }
  0x18   :  { %249 = vmatpush.bf16.msra.mxu1 %v1283_v9  ;;  %1341 = vmatpush.bf16.msra.mxu2 %v1283_v9 }
  0x1c   :  { %250 = vmatpush.bf16.msra.mxu1 %v1282_v14  ;;  %1342 = vmatpush.bf16.msra.mxu2 %v1282_v14 }
  0x20   :  { %251 = vmatpush.bf16.msra.mxu1 %v1281_v17  ;;  %1343 = vmatpush.bf16.msra.mxu2 %v1281_v17 }
  0x22   :  { %1026 = vmatmul.msk.bf16.gmra.mxu0 %vm117_vm0, %v102_v15 }
  0x23   :  { %1028 = vmatmul.msk.bf16.gmra.mxu3 %vm117_vm0, %v104_v16 }
  0x24   :  { %252 = vmatpush.bf16.msra.mxu1 %v1280_v18  ;;  %1344 = vmatpush.bf16.msra.mxu2 %v1280_v18 }
  0x28   :  { %253 = vmatpush.bf16.msra.mxu1 %v1279_v19  ;;  %1345 = vmatpush.bf16.msra.mxu2 %v1279_v19 }
  0x2c   :  { %254 = vmatpush.bf16.msra.mxu1 %v1278_v20  ;;  %1346 = vmatpush.bf16.msra.mxu2 %v1278_v20 }
  0x30   :  { %364 = vmatpush.bf16.msrb.mxu2 %v1293_v25 }
  0x34   :  { %365 = vmatpush.bf16.msrb.mxu2 %v1292_v30  ;;  %v1299_v30 = vld [vmem:[#allocation7 + $0x28] sm:$0xff] }
  0x38   :  { %366 = vmatpush.bf16.msrb.mxu2 %v1291_v35 }
  0x3c   :  { %367 = vmatpush.bf16.msrb.mxu2 %v1290_v42 }
  0x40   :  { %368 = vmatpush.bf16.msrb.mxu2 %v1289_v62 }
  0x44   :  { %369 = vmatpush.bf16.msrb.mxu2 %v1288_v63 }
  0x48   :  { %370 = vmatpush.bf16.msrb.mxu2 %v1287_v0 }
  0x4c   :  { %371 = vmatpush.bf16.msrb.mxu2 %v1286_v1 }
  0x8f   :  { %v139_v21 = vpop.f32.mrf.mxu0 }
  0x90   :  { %v140_v23 = vadd.f32 %v1355_v22, %v139_v21 }
  0x92   :  { %v159_v27 = vmul.f32 0.2, %v140_v23 }
  0x94   :  { %v167_v32 = vmax.f32 %v140_v23, %v159_v27  ;;  %v1301_v23 = vld [vmem:[#allocation7 + $0x38] sm:$0xff] }
  0x95   :  { %481 = vmatpush.bf16.msrb.mxu3 %v1301_v23 }
  0x96   :  { %v149_v24 = vpop.f32.mrf.mxu3 }
  0x97   :  { %v141_v26 = vpop.f32.mrf.mxu0  ;;  %v150_v28 = vadd.f32 %v1355_v22, %v149_v24 }
  0x98   :  { %v142_v29 = vadd.f32 %v1355_v22, %v141_v26  ;;  %v1300_v26 = vld [vmem:[#allocation7 + $0x30] sm:$0xff] }
  0x99   :  { %v163_v33 = vmul.f32 0.2, %v150_v28  ;;  %482 = vmatpush.bf16.msrb.mxu3 %v1300_v26  ;;  %v1311_v26 = vld [vmem:[%s1893_s9 + $0x44] sm:$0xf0] }
  0x9a   :  { %v160_v31 = vmul.f32 0.2, %v142_v29 }
  0x9b   :  { %v171_v40 = vmax.f32 %v150_v28, %v163_v33  ;;  %v1298_v33 = vld [vmem:[#allocation7 + $0x20] sm:$0xff] }
  0x9c   :  { %v168_v34 = vmax.f32 %v142_v29, %v160_v31 }
  0x9d   :  { %483 = vmatpush.bf16.msrb.mxu3 %v1299_v30 }
  0x9e   :  { %v151_v36 = vpop.f32.mrf.mxu3  ;;  %v175_v38 = vpack.c.bf16 %v168_v34, %v167_v32 }
  0x9f   :  { %v152_v37 = vadd.f32 %v1355_v22, %v151_v36  ;;  %v144_v39 = vpop.f32.mrf.mxu0 }
  0xa0   :  { %255 = vmatmul.bf16.vlgmr.msra.gmra.mxu1 %v175_v38  ;;  %v145_v44 = vadd.f32 %v1355_v22, %v144_v39 }
  0xa1   :  { %v164_v41 = vmul.f32 0.2, %v152_v37  ;;  %484 = vmatpush.bf16.msrb.mxu3 %v1298_v33 }
  0xa2   :  { %v161_v48 = vmul.f32 0.2, %v145_v44 }
  0xa3   :  { %v172_v43 = vmax.f32 %v152_v37, %v164_v41 }
  0xa4   :  { %v169_v52 = vmax.f32 %v145_v44, %v161_v48  ;;  %v1296_v44 = vld [vmem:[#allocation7 + $0x10] sm:$0xff]  ;;  %v1588_v48 = vld [vmem:[%s1890_s6] ss:$0 sm:$0xff] }
  0xa5   :  { %v177_v45 = vpack.c.bf16 %v172_v43, %v171_v40  ;;  %v1297_v43 = vld [vmem:[#allocation7 + $0x18] sm:$0xff] }
  0xa6   :  { %v154_v46 = vpop.f32.mrf.mxu3  ;;  %485 = vmatpush.bf16.msrb.mxu3 %v1297_v43 }
  0xa7   :  { %265 = vmatmul.bf16.vlgmr.msra.gmra.mxu2 %v177_v45  ;;  %v146_v47 = vpop.f32.mrf.mxu0  ;;  %v155_v49 = vadd.f32 %v1355_v22, %v154_v46  ;;  %v1295_v45 = vld [vmem:[#allocation7 + $0x8] sm:$0xff]  ;;  %v1294_v46 = vld [vmem:[#allocation7] sm:$0xff] }
  0xa8   :  { %v147_v50 = vadd.f32 %v1355_v22, %v146_v47 }
  0xa9   :  { %v165_v53 = vmul.f32 0.2, %v155_v49 }
  0xaa   :  { %v162_v51 = vmul.f32 0.2, %v147_v50  ;;  %486 = vmatpush.bf16.msrb.mxu3 %v1296_v44  ;;  %v1151_v44 = vld [vmem:[%s1893_s9 + $0x30] sm:$0xf] }
  0xab   :  { %v173_v58 = vmax.f32 %v155_v49, %v165_v53 }
  0xac   :  { %v170_v54 = vmax.f32 %v147_v50, %v162_v51 }
  0xae   :  { %v156_v55 = vpop.f32.mrf.mxu3  ;;  %v176_v57 = vpack.c.bf16 %v170_v54, %v169_v52  ;;  %487 = vmatpush.bf16.msrb.mxu3 %v1295_v45  ;;  %v1309_v45 = vld [vmem:[%s1893_s9 + $0x34] sm:$0xf0] }
  0xaf   :  { %v157_v56 = vadd.f32 %v1355_v22, %v156_v55 }
  0xb0   :  { %260 = vmatmul.bf16.gmra.mxu1 %v176_v57 }
  0xb1   :  { %v166_v59 = vmul.f32 0.2, %v157_v56 }
  0xb2   :  { %488 = vmatpush.bf16.msrb.mxu3 %v1294_v46  ;;  %v1308_v46 = vld [vmem:[%s1893_s9 + $0x34] sm:$0xf] }
  0xb3   :  { %v174_v60 = vmax.f32 %v157_v56, %v166_v59 }
  0xb5   :  { %v178_v61 = vpack.c.bf16 %v174_v60, %v173_v58 }
  0xb7   :  { %270 = vmatmul.bf16.gmra.mxu2 %v178_v61 }
 0x11d   :  { %v256_v2 = vpop.f32.mrf.mxu1 }
 0x11e   :  { %v257_v4 = vadd.f32 %v1356_v3, %v256_v2 }
 0x120   :  { %v276_v6 = vmul.f32 0.2, %v257_v4 }
 0x122   :  { %v284_v9 = vmax.f32 %v257_v4, %v276_v6  ;;  %v1317_v4 = vld [vmem:[%s1893_s9 + $0x74] sm:$0xf0] }
 0x125   :  { %v258_v5 = vpop.f32.mrf.mxu1 }
 0x126   :  { %v259_v7 = vadd.f32 %v1356_v3, %v258_v5  ;;  %v1316_v5 = vld [vmem:[%s1893_s9 + $0x74] sm:$0xf] }
 0x128   :  { %v277_v8 = vmul.f32 0.2, %v259_v7 }
 0x12a   :  { %v285_v10 = vmax.f32 %v259_v7, %v277_v8  ;;  %v266_v13 = vpop.f32.mrf.mxu2  ;;  %v1185_v7 = vld [vmem:[%s1893_s9 + $0x78] sm:$0xf0]  ;;  %v1175_v8 = vld [vmem:[%s1893_s9 + $0x60] sm:$0xf] }
 0x12b   :  { %v267_v24 = vadd.f32 %v1356_v3, %v266_v13 }
 0x12c   :  { %v292_v11 = vpack.c.bf16 %v285_v10, %v284_v9  ;;  %v1315_v9 = vld [vmem:[%s1893_s9 + $0x64] sm:$0xf0]  ;;  %v1188_v10 = vor.u32 %v1316_v5, %v1185_v7  ;;  %v1697_v5 = vld [vmem:[%s1892_s8] ss:$0 sm:$0xff] }
 0x12d   :  { %v261_v12 = vpop.f32.mrf.mxu1  ;;  %v280_v28 = vmul.f32 0.2, %v267_v24  ;;  %v1176_v13 = vor.u32 %v1315_v9, %v1175_v8 }
 0x12e   :  { %372 = vmatmul.bf16.vlgmr.msrb.gmra.mxu2 %v292_v11  ;;  %v262_v14 = vadd.f32 %v1356_v3, %v261_v12  ;;  %v1314_v11 = vld [vmem:[%s1893_s9 + $0x64] sm:$0xf]  ;;  %v1177_v12 = vld [vmem:[%s1893_s9 + $0x68] sm:$0xf0]  ;;  %661 = vmatpush.bf16.msrb.mxu1 %v1188_v10 }
 0x12f   :  { %v288_v31 = vmax.f32 %v267_v24, %v280_v28  ;;  %v1161_v28 = vld [vmem:[%s1893_s9 + $0x48] sm:$0xf0] }
 0x130   :  { %v278_v16 = vmul.f32 0.2, %v262_v14 }
 0x132   :  { %v268_v19 = vpop.f32.mrf.mxu2  ;;  %v286_v20 = vmax.f32 %v262_v14, %v278_v16  ;;  %v1167_v16 = vld [vmem:[%s1893_s9 + $0x50] sm:$0xf] }
 0x133   :  { %v269_v25 = vadd.f32 %v1356_v3, %v268_v19  ;;  %v1169_v19 = vld [vmem:[%s1893_s9 + $0x58] sm:$0xf0] }
 0x135   :  { %v263_v15 = vpop.f32.mrf.mxu1  ;;  %v281_v29 = vmul.f32 0.2, %v269_v25 }
 0x136   :  { %v264_v17 = vadd.f32 %v1356_v3, %v263_v15  ;;  %v1180_v15 = vor.u32 %v1314_v11, %v1177_v12 }
 0x137   :  { %v289_v32 = vmax.f32 %v269_v25, %v281_v29  ;;  %v1159_v25 = vld [vmem:[%s1893_s9 + $0x40] sm:$0xf] }
 0x138   :  { %v279_v18 = vmul.f32 0.2, %v264_v17  ;;  %662 = vmatpush.bf16.msrb.mxu1 %v1180_v15  ;;  %v1160_v30 = vor.u32 %v1311_v26, %v1159_v25  ;;  %v1333_v25 = vld [vmem:[%s1895_s11 + $0x74] sm:$0xf0]  ;;  %v1263_v26 = vld [vmem:[%s1895_s11 + $0x90] sm:$0xf] }
 0x139   :  { %v294_v34 = vpack.c.bf16 %v289_v32, %v288_v31 }
 0x13a   :  { %v287_v21 = vmax.f32 %v264_v17, %v279_v18  ;;  %v271_v27 = vpop.f32.mrf.mxu2  ;;  %v1313_v17 = vld [vmem:[%s1893_s9 + $0x54] sm:$0xf0]  ;;  %v1312_v18 = vld [vmem:[%s1893_s9 + $0x54] sm:$0xf] }
 0x13b   :  { %v272_v36 = vadd.f32 %v1356_v3, %v271_v27  ;;  %v1172_v24 = vor.u32 %v1312_v18, %v1169_v19  ;;  %v1310_v27 = vld [vmem:[%s1893_s9 + $0x44] sm:$0xf] }
 0x13c   :  { %v293_v22 = vpack.c.bf16 %v287_v21, %v286_v20  ;;  %v1168_v21 = vor.u32 %v1313_v17, %v1167_v16  ;;  %v1164_v33 = vor.u32 %v1310_v27, %v1161_v28  ;;  %v1337_v28 = vld [vmem:[%s1895_s11 + $0x94] sm:$0xf0] }
 0x13d   :  { %v282_v38 = vmul.f32 0.2, %v272_v36  ;;  %663 = vmatpush.bf16.msrb.mxu1 %v1172_v24  ;;  %v1247_v24 = vld [vmem:[%s1895_s11 + $0x70] sm:$0xf] }
 0x13e   :  { %377 = vmatmul.bf16.gmra.mxu2 %v293_v22  ;;  %v1248_v27 = vor.u32 %v1333_v25, %v1247_v24 }
 0x13f   :  { %v290_v40 = vmax.f32 %v272_v36, %v282_v38 }
 0x140   :  { %869 = vmatpush.bf16.msra.mxu2 %v1248_v27  ;;  %v1321_v27 = vld [vmem:[%s1895_s11 + $0x14] sm:$0xf0] }
 0x141   :  { %664 = vmatpush.bf16.msrb.mxu1 %v1164_v33  ;;  %v1239_v33 = vld [vmem:[%s1895_s11 + $0x60] sm:$0xf] }
 0x142   :  { %v273_v35 = vpop.f32.mrf.mxu2 }
 0x143   :  { %v274_v37 = vadd.f32 %v1356_v3, %v273_v35  ;;  %v1183_v3 = vld [vmem:[%s1893_s9 + $0x70] sm:$0xf] }
 0x144   :  { %v1184_v6 = vor.u32 %v1317_v4, %v1183_v3 }
 0x145   :  { %v283_v39 = vmul.f32 0.2, %v274_v37 }
 0x146   :  { %632 = vmatpush.bf16.msrb.mxu0 %v1184_v6 }
 0x147   :  { %v291_v41 = vmax.f32 %v274_v37, %v283_v39 }
 0x149   :  { %v295_v42 = vpack.c.bf16 %v291_v41, %v290_v40 }
 0x14a   :  { %633 = vmatpush.bf16.msrb.mxu0 %v1176_v13 }
 0x14e   :  { %382 = vmatmul.bf16.gmra.mxu2 %v294_v34  ;;  %634 = vmatpush.bf16.msrb.mxu0 %v1168_v21 }
 0x152   :  { %635 = vmatpush.bf16.msrb.mxu0 %v1160_v30  ;;  %v1249_v30 = vld [vmem:[%s1895_s11 + $0x78] sm:$0xf0] }
 0x15e   :  { %387 = vmatmul.bf16.gmra.mxu2 %v295_v42 }
 0x1b1   :  { %v373_v47 = vpop.f32.mrf.mxu2 }
 0x1b2   :  { %v374_v49 = vadd.f32 %v1588_v48, %v373_v47  ;;  %v1152_v47 = vor.u32 %v1309_v45, %v1151_v44  ;;  %v1328_v45 = vld [vmem:[%s1895_s11 + $0x54] sm:$0xf] }
 0x1b4   :  { %v393_v51 = vmul.f32 0.2, %v374_v49  ;;  %636 = vmatpush.bf16.msrb.mxu0 %v1152_v47 }
 0x1b6   :  { %v401_v54 = vmax.f32 %v374_v49, %v393_v51  ;;  %v1307_v51 = vld [vmem:[%s1893_s9 + $0x24] sm:$0xf0] }
 0x1b9   :  { %v375_v50 = vpop.f32.mrf.mxu2 }
 0x1ba   :  { %v376_v52 = vadd.f32 %v1588_v48, %v375_v50  ;;  %v1143_v50 = vld [vmem:[%s1893_s9 + $0x20] sm:$0xf] }
 0x1bc   :  { %v394_v53 = vmul.f32 0.2, %v376_v52 }
 0x1be   :  { %v402_v55 = vmax.f32 %v376_v52, %v394_v53  ;;  %v1306_v52 = vld [vmem:[%s1893_s9 + $0x24] sm:$0xf]  ;;  %v1144_v53 = vor.u32 %v1307_v51, %v1143_v50  ;;  %v1255_v50 = vld [vmem:[%s1895_s11 + $0x80] sm:$0xf] }
 0x1c0   :  { %v409_v56 = vpack.c.bf16 %v402_v55, %v401_v54  ;;  %v1145_v54 = vld [vmem:[%s1893_s9 + $0x28] sm:$0xf0]  ;;  %637 = vmatpush.bf16.msrb.mxu0 %v1144_v53  ;;  %v1223_v53 = vld [vmem:[%s1895_s11 + $0x40] sm:$0xf] }
 0x1c1   :  { %v378_v57 = vpop.f32.mrf.mxu2  ;;  %v1148_v55 = vor.u32 %v1306_v52, %v1145_v54  ;;  %v1327_v54 = vld [vmem:[%s1895_s11 + $0x44] sm:$0xf0] }
 0x1c2   :  { %489 = vmatmul.bf16.vlgmr.msrb.gmra.mxu3 %v409_v56  ;;  %v379_v58 = vadd.f32 %v1588_v48, %v378_v57  ;;  %v1135_v56 = vld [vmem:[%s1893_s9 + $0x10] sm:$0xf]  ;;  %v1305_v57 = vld [vmem:[%s1893_s9 + $0x14] sm:$0xf0] }
 0x1c4   :  { %v395_v60 = vmul.f32 0.2, %v379_v58 }
 0x1c6   :  { %v403_v63 = vmax.f32 %v379_v58, %v395_v60  ;;  %v1304_v58 = vld [vmem:[%s1893_s9 + $0x14] sm:$0xf]  ;;  %v1137_v60 = vld [vmem:[%s1893_s9 + $0x18] sm:$0xf0] }
 0x1c9   :  { %v380_v59 = vpop.f32.mrf.mxu2 }
 0x1ca   :  { %v381_v61 = vadd.f32 %v1588_v48, %v380_v59  ;;  %v1136_v59 = vor.u32 %v1305_v57, %v1135_v56  ;;  %v1326_v56 = vld [vmem:[%s1895_s11 + $0x44] sm:$0xf] }
 0x1cc   :  { %v396_v62 = vmul.f32 0.2, %v381_v61  ;;  %638 = vmatpush.bf16.msrb.mxu0 %v1136_v59 }
 0x1ce   :  { %v404_v0 = vmax.f32 %v381_v61, %v396_v62  ;;  %v1140_v61 = vor.u32 %v1304_v58, %v1137_v60  ;;  %v1127_v62 = vld [vmem:[%s1893_s9] sm:$0xf]  ;;  %v1334_v58 = vld [vmem:[%s1895_s11 + $0x84] sm:$0xf]  ;;  %v1225_v60 = vld [vmem:[%s1895_s11 + $0x48] sm:$0xf0] }
 0x1d0   :  { %v410_v1 = vpack.c.bf16 %v404_v0, %v403_v63  ;;  %v1303_v63 = vld [vmem:[%s1893_s9 + $0x4] sm:$0xf0]  ;;  %v1302_v0 = vld [vmem:[%s1893_s9 + $0x4] sm:$0xf] }
 0x1d1   :  { %v383_v2 = vpop.f32.mrf.mxu2 }
 0x1d2   :  { %494 = vmatmul.bf16.gmra.mxu3 %v410_v1  ;;  %v384_v14 = vadd.f32 %v1588_v48, %v383_v2  ;;  %v1128_v1 = vor.u32 %v1303_v63, %v1127_v62  ;;  %v1129_v2 = vld [vmem:[%s1893_s9 + $0x8] sm:$0xf0]  ;;  %v1224_v62 = vor.u32 %v1327_v54, %v1223_v53 }
 0x1d3   :  { %v1132_v3 = vor.u32 %v1302_v0, %v1129_v2  ;;  %v1215_v2 = vld [vmem:[%s1895_s11 + $0x30] sm:$0xf] }
 0x1d4   :  { %v397_v22 = vmul.f32 0.2, %v384_v14  ;;  %639 = vmatpush.bf16.msrb.mxu0 %v1128_v1 }
 0x1d6   :  { %v405_v31 = vmax.f32 %v384_v14, %v397_v22 }
 0x1d9   :  { %v385_v20 = vpop.f32.mrf.mxu2 }
 0x1da   :  { %v386_v23 = vadd.f32 %v1588_v48, %v385_v20 }
 0x1dc   :  { %v398_v29 = vmul.f32 0.2, %v386_v23 }
 0x1de   :  { %v406_v32 = vmax.f32 %v386_v23, %v398_v29  ;;  %v1332_v29 = vld [vmem:[%s1895_s11 + $0x74] sm:$0xf] }
 0x1e0   :  { %v411_v34 = vpack.c.bf16 %v406_v32, %v405_v31  ;;  %v1264_v31 = vor.u32 %v1337_v28, %v1263_v26  ;;  %v1252_v32 = vor.u32 %v1332_v29, %v1249_v30  ;;  %v1199_v26 = vld [vmem:[%s1895_s11 + $0x10] sm:$0xf]  ;;  %v1320_v28 = vld [vmem:[%s1895_s11 + $0x14] sm:$0xf]  ;;  %v1201_v29 = vld [vmem:[%s1895_s11 + $0x18] sm:$0xf0] }
 0x1e1   :  { %v388_v35 = vpop.f32.mrf.mxu2  ;;  %v1204_v30 = vor.u32 %v1320_v28, %v1201_v29 }
 0x1e2   :  { %499 = vmatmul.bf16.gmra.mxu3 %v411_v34  ;;  %v389_v36 = vadd.f32 %v1588_v48, %v388_v35  ;;  %v1331_v34 = vld [vmem:[%s1895_s11 + $0x64] sm:$0xf0]  ;;  %927 = vmatpush.bf16.msra.mxu0 %v1252_v32 }
 0x1e3   :  { %904 = vmatpush.bf16.msra.mxu3 %v1264_v31  ;;  %v1191_v31 = vld [vmem:[%s1895_s11] sm:$0xf]  ;;  %v1319_v32 = vld [vmem:[%s1895_s11 + $0x4] sm:$0xf0] }
 0x1e4   :  { %v399_v38 = vmul.f32 0.2, %v389_v36 }
 0x1e6   :  { %v407_v41 = vmax.f32 %v389_v36, %v399_v38  ;;  %v1240_v36 = vor.u32 %v1331_v34, %v1239_v33  ;;  %v1265_v38 = vld [vmem:[%s1895_s11 + $0x98] sm:$0xf0]  ;;  %v1318_v33 = vld [vmem:[%s1895_s11 + $0x4] sm:$0xf]  ;;  %v1192_v34 = vor.u32 %v1319_v32, %v1191_v31 }
 0x1e8   :  { %870 = vmatpush.bf16.msra.mxu2 %v1240_v36 }
 0x1e9   :  { %v390_v37 = vpop.f32.mrf.mxu2 }
 0x1ea   :  { %v391_v39 = vadd.f32 %v1588_v48, %v390_v37  ;;  %v1153_v48 = vld [vmem:[%s1893_s9 + $0x38] sm:$0xf0]  ;;  %v1336_v37 = vld [vmem:[%s1895_s11 + $0x94] sm:$0xf] }
 0x1eb   :  { %v1156_v49 = vor.u32 %v1308_v46, %v1153_v48  ;;  %v1233_v46 = vld [vmem:[%s1895_s11 + $0x58] sm:$0xf0] }
 0x1ec   :  { %v400_v40 = vmul.f32 0.2, %v391_v39  ;;  %v1236_v52 = vor.u32 %v1328_v45, %v1233_v46 }
 0x1ed   :  { %665 = vmatpush.bf16.msrb.mxu1 %v1156_v49 }
 0x1ee   :  { %v408_v42 = vmax.f32 %v391_v39, %v400_v40  ;;  %v1330_v39 = vld [vmem:[%s1895_s11 + $0x64] sm:$0xf]  ;;  %v1268_v40 = vor.u32 %v1336_v37, %v1265_v38  ;;  %v546_v37 = vld [vmem:[%s1894_s10] sm:$0x3] }
 0x1f0   :  { %v412_v43 = vpack.c.bf16 %v408_v42, %v407_v41  ;;  %v1241_v41 = vld [vmem:[%s1895_s11 + $0x68] sm:$0xf0]  ;;  %v1231_v42 = vld [vmem:[%s1895_s11 + $0x50] sm:$0xf] }
 0x1f1   :  { %666 = vmatpush.bf16.msrb.mxu1 %v1148_v55  ;;  %v1244_v44 = vor.u32 %v1330_v39, %v1241_v41  ;;  %v1335_v55 = vld [vmem:[%s1895_s11 + $0x84] sm:$0xf0]  ;;  %v1832_v41 = vperm.slane %v546_v37, 1 }
 0x1f2   :  { %504 = vmatmul.bf16.gmra.mxu3 %v412_v43  ;;  %v1329_v43 = vld [vmem:[%s1895_s11 + $0x54] sm:$0xf0]  ;;  %v1256_v57 = vor.u32 %v1335_v55, %v1255_v50 }
 0x1f3   :  { %v1232_v49 = vor.u32 %v1329_v43, %v1231_v42  ;;  %928 = vmatpush.bf16.msra.mxu0 %v1244_v44 }
 0x1f4   :  { %905 = vmatpush.bf16.msra.mxu3 %v1256_v57 }
 0x1f5   :  { %667 = vmatpush.bf16.msrb.mxu1 %v1140_v61  ;;  %v1257_v61 = vld [vmem:[%s1895_s11 + $0x88] sm:$0xf0]  ;;  %871 = vmatpush.bf16.msra.mxu2 %v1232_v49 }
 0x1f6   :  { %v1260_v63 = vor.u32 %v1334_v58, %v1257_v61 }
 0x1f7   :  { %929 = vmatpush.bf16.msra.mxu0 %v1236_v52 }
 0x1f9   :  { %668 = vmatpush.bf16.msrb.mxu1 %v1132_v3  ;;  %v1325_v3 = vld [vmem:[%s1895_s11 + $0x34] sm:$0xf0]  ;;  %872 = vmatpush.bf16.msra.mxu2 %v1224_v62 }
 0x1fd   :  { %962 = vmatpush.bf16.msra.mxu1 %v1268_v40  ;;  %v1830_v40 = vperm.slane %v546_v37, 0 }
 0x201   :  { %963 = vmatpush.bf16.msra.mxu1 %v1260_v63 }
 0x245   :  { %v490_v4 = vpop.f32.mrf.mxu3 }
 0x246   :  { %v491_v6 = vadd.f32 %v1697_v5, %v490_v4  ;;  %v1228_v4 = vor.u32 %v1326_v56, %v1225_v60 }
 0x248   :  { %v510_v8 = vmul.f32 0.2, %v491_v6  ;;  %930 = vmatpush.bf16.msra.mxu0 %v1228_v4 }
 0x24a   :  { %v518_v11 = vmax.f32 %v491_v6, %v510_v8  ;;  %v1217_v8 = vld [vmem:[%s1895_s11 + $0x38] sm:$0xf0] }
 0x24d   :  { %v492_v7 = vpop.f32.mrf.mxu3 }
 0x24e   :  { %v493_v9 = vadd.f32 %v1697_v5, %v492_v7  ;;  %v1324_v7 = vld [vmem:[%s1895_s11 + $0x34] sm:$0xf] }
 0x250   :  { %v511_v10 = vmul.f32 0.2, %v493_v9 }
 0x252   :  { %v519_v12 = vmax.f32 %v493_v9, %v511_v10  ;;  %v1216_v10 = vor.u32 %v1325_v3, %v1215_v2 }
 0x254   :  { %v526_v13 = vpack.c.bf16 %v519_v12, %v518_v11  ;;  %v1207_v11 = vld [vmem:[%s1895_s11 + $0x20] sm:$0xf]  ;;  %v1323_v12 = vld [vmem:[%s1895_s11 + $0x24] sm:$0xf0]  ;;  %873 = vmatpush.bf16.msra.mxu2 %v1216_v10 }
 0x255   :  { %v495_v14 = vpop.f32.mrf.mxu3 }
 0x256   :  { %640 = vmatmul.bf16.vlgmr.msrb.gmra.mxu0 %v526_v13  ;;  %669 = vmatmul.bf16.vlgmr.msrb.gmra.mxu1 %v526_v13  ;;  %v496_v15 = vadd.f32 %v1697_v5, %v495_v14  ;;  %v1220_v13 = vor.u32 %v1324_v7, %v1217_v8  ;;  %v1322_v14 = vld [vmem:[%s1895_s11 + $0x24] sm:$0xf] }
 0x258   :  { %v512_v17 = vmul.f32 0.2, %v496_v15  ;;  %931 = vmatpush.bf16.msra.mxu0 %v1220_v13 }
 0x25a   :  { %v520_v20 = vmax.f32 %v496_v15, %v512_v17  ;;  %v1209_v15 = vld [vmem:[%s1895_s11 + $0x28] sm:$0xf0] }
 0x25d   :  { %v497_v16 = vpop.f32.mrf.mxu3 }
 0x25e   :  { %v498_v18 = vadd.f32 %v1697_v5, %v497_v16  ;;  %v1208_v16 = vor.u32 %v1323_v12, %v1207_v11 }
 0x260   :  { %v513_v19 = vmul.f32 0.2, %v498_v18  ;;  %874 = vmatpush.bf16.msra.mxu2 %v1208_v16 }
 0x262   :  { %v521_v21 = vmax.f32 %v498_v18, %v513_v19  ;;  %v1212_v18 = vor.u32 %v1322_v14, %v1209_v15 }
 0x264   :  { %v527_v22 = vpack.c.bf16 %v521_v21, %v520_v20  ;;  %932 = vmatpush.bf16.msra.mxu0 %v1212_v18 }
 0x265   :  { %v500_v23 = vpop.f32.mrf.mxu3 }
 0x266   :  { %645 = vmatmul.bf16.gmra.mxu0 %v527_v22  ;;  %674 = vmatmul.bf16.gmra.mxu1 %v527_v22  ;;  %v501_v35 = vadd.f32 %v1697_v5, %v500_v23 }
 0x268   :  { %v514_v47 = vmul.f32 0.2, %v501_v35  ;;  %933 = vmatpush.bf16.msra.mxu0 %v1204_v30 }
 0x26a   :  { %v522_v0 = vmax.f32 %v501_v35, %v514_v47  ;;  %v1193_v35 = vld [vmem:[%s1895_s11 + $0x8] sm:$0xf0] }
 0x26b   :  { %v1196_v36 = vor.u32 %v1318_v33, %v1193_v35 }
 0x26d   :  { %v502_v48 = vpop.f32.mrf.mxu3  ;;  %934 = vmatpush.bf16.msra.mxu0 %v1196_v36 }
 0x26e   :  { %v503_v51 = vadd.f32 %v1697_v5, %v502_v48 }
 0x270   :  { %v515_v59 = vmul.f32 0.2, %v503_v51 }
 0x272   :  { %v523_v1 = vmax.f32 %v503_v51, %v515_v59 }
 0x274   :  { %v528_v6 = vpack.c.bf16 %v523_v1, %v522_v0 }
 0x275   :  { %v505_v9 = vpop.f32.mrf.mxu3 }
 0x276   :  { %650 = vmatmul.bf16.gmra.mxu0 %v528_v6  ;;  %679 = vmatmul.bf16.gmra.mxu1 %v528_v6  ;;  %v506_v17 = vadd.f32 %v1697_v5, %v505_v9 }
 0x278   :  { %v516_v20 = vmul.f32 0.2, %v506_v17 }
 0x27a   :  { %v524_v23 = vmax.f32 %v506_v17, %v516_v20 }
 0x27d   :  { %v507_v19 = vpop.f32.mrf.mxu3 }
 0x27e   :  { %v508_v21 = vadd.f32 %v1697_v5, %v507_v19  ;;  %v1200_v5 = vor.u32 %v1321_v27, %v1199_v26 }
 0x280   :  { %v517_v22 = vmul.f32 0.2, %v508_v21  ;;  %875 = vmatpush.bf16.msra.mxu2 %v1200_v5 }
 0x282   :  { %v525_v24 = vmax.f32 %v508_v21, %v517_v22 }
 0x284   :  { %v529_v25 = vpack.c.bf16 %v525_v24, %v524_v23  ;;  %876 = vmatpush.bf16.msra.mxu2 %v1192_v34 }
 0x286   :  { %655 = vmatmul.bf16.gmra.mxu0 %v529_v25  ;;  %684 = vmatmul.bf16.gmra.mxu1 %v529_v25 }
 0x2d3   :  { %v641_v38 = vpop.f32.mrf.mxu0  ;;  %v670_v39 = vpop.f32.mrf.mxu1 }
 0x2d4   :  { %v642_v42 = vadd.f32 %v641_v38, %v1830_v40  ;;  %v671_v43 = vadd.f32 %v670_v39, %v1832_v41 }
 0x2d6   :  { %v690_v46 = vmul.f32 0.2, %v642_v42  ;;  %v691_v47 = vmul.f32 0.2, %v671_v43 }
 0x2d8   :  { %v706_v52 = vmax.f32 %v642_v42, %v690_v46  ;;  %v707_v53 = vmax.f32 %v671_v43, %v691_v47 }
 0x2db   :  { %v643_v44 = vpop.f32.mrf.mxu0  ;;  %v672_v45 = vpop.f32.mrf.mxu1 }
 0x2dc   :  { %v644_v48 = vadd.f32 %v643_v44, %v1830_v40  ;;  %v673_v49 = vadd.f32 %v672_v45, %v1832_v41 }
 0x2de   :  { %v692_v50 = vmul.f32 0.2, %v644_v48  ;;  %v693_v51 = vmul.f32 0.2, %v673_v49 }
 0x2e0   :  { %v708_v54 = vmax.f32 %v644_v48, %v692_v50  ;;  %v709_v55 = vmax.f32 %v673_v49, %v693_v51 }
 0x2e2   :  { %v722_v56 = vpack.c.bf16 %v708_v54, %v706_v52  ;;  %v723_v57 = vpack.c.bf16 %v709_v55, %v707_v53 }
 0x2e3   :  { %v646_v58 = vpop.f32.mrf.mxu0  ;;  %v675_v59 = vpop.f32.mrf.mxu1 }
 0x2e4   :  { %877 = vmatmul.bf16.vlgmr.msra.gmra.mxu2 %v722_v56  ;;  %1269 = vmatmul.msk.bf16.vlgmr.msra.gmra.mxu3 %vm856_vm1, %v723_v57  ;;  %v647_v60 = vadd.f32 %v646_v58, %v1830_v40  ;;  %v676_v61 = vadd.f32 %v675_v59, %v1832_v41 }
 0x2e5   :  { %935 = vmatmul.bf16.vlgmr.msra.gmra.mxu0 %v722_v56  ;;  %1273 = vmatmul.msk.bf16.vlgmr.msra.gmra.mxu1 %vm856_vm1, %v723_v57 }
 0x2e6   :  { %v694_v0 = vmul.f32 0.2, %v647_v60  ;;  %v695_v1 = vmul.f32 0.2, %v676_v61 }
 0x2e8   :  { %v710_v7 = vmax.f32 %v647_v60, %v694_v0  ;;  %v711_v8 = vmax.f32 %v676_v61, %v695_v1 }
 0x2eb   :  { %v648_v62 = vpop.f32.mrf.mxu0  ;;  %v677_v63 = vpop.f32.mrf.mxu1 }
 0x2ec   :  { %v649_v2 = vadd.f32 %v648_v62, %v1830_v40  ;;  %v678_v3 = vadd.f32 %v677_v63, %v1832_v41 }
 0x2ee   :  { %v696_v4 = vmul.f32 0.2, %v649_v2  ;;  %v697_v6 = vmul.f32 0.2, %v678_v3 }
 0x2f0   :  { %v712_v9 = vmax.f32 %v649_v2, %v696_v4  ;;  %v713_v10 = vmax.f32 %v678_v3, %v697_v6 }
 0x2f2   :  { %v724_v11 = vpack.c.bf16 %v712_v9, %v710_v7  ;;  %v725_v12 = vpack.c.bf16 %v713_v10, %v711_v8 }
 0x2f3   :  { %v651_v13 = vpop.f32.mrf.mxu0  ;;  %v680_v14 = vpop.f32.mrf.mxu1 }
 0x2f4   :  { %882 = vmatmul.bf16.gmra.mxu2 %v724_v11  ;;  %1270 = vmatmul.msk.bf16.gmra.mxu3 %vm856_vm1, %v725_v12  ;;  %v652_v15 = vadd.f32 %v651_v13, %v1830_v40  ;;  %v681_v16 = vadd.f32 %v680_v14, %v1832_v41 }
 0x2f5   :  { %940 = vmatmul.bf16.gmra.mxu0 %v724_v11  ;;  %1274 = vmatmul.msk.bf16.gmra.mxu1 %vm856_vm1, %v725_v12 }
 0x2f6   :  { %v698_v19 = vmul.f32 0.2, %v652_v15  ;;  %v699_v20 = vmul.f32 0.2, %v681_v16 }
 0x2f8   :  { %v714_v25 = vmax.f32 %v652_v15, %v698_v19  ;;  %v715_v26 = vmax.f32 %v681_v16, %v699_v20 }
 0x2fb   :  { %v653_v17 = vpop.f32.mrf.mxu0  ;;  %v682_v18 = vpop.f32.mrf.mxu1 }
 0x2fc   :  { %v654_v21 = vadd.f32 %v653_v17, %v1830_v40  ;;  %v683_v22 = vadd.f32 %v682_v18, %v1832_v41 }
 0x2fe   :  { %v700_v23 = vmul.f32 0.2, %v654_v21  ;;  %v701_v24 = vmul.f32 0.2, %v683_v22 }
 0x300   :  { %v716_v27 = vmax.f32 %v654_v21, %v700_v23  ;;  %v717_v28 = vmax.f32 %v683_v22, %v701_v24 }
 0x302   :  { %v726_v5 = vpack.c.bf16 %v716_v27, %v714_v25  ;;  %v727_v29 = vpack.c.bf16 %v717_v28, %v715_v26 }
 0x303   :  { %v656_v30 = vpop.f32.mrf.mxu0  ;;  %v685_v31 = vpop.f32.mrf.mxu1 }
 0x304   :  { %887 = vmatmul.bf16.gmra.mxu2 %v726_v5  ;;  %1271 = vmatmul.msk.bf16.gmra.mxu3 %vm856_vm1, %v727_v29  ;;  %v657_v32 = vadd.f32 %v656_v30, %v1830_v40  ;;  %v686_v33 = vadd.f32 %v685_v31, %v1832_v41 }
 0x305   :  { %945 = vmatmul.bf16.gmra.mxu0 %v726_v5  ;;  %1275 = vmatmul.msk.bf16.gmra.mxu1 %vm856_vm1, %v727_v29 }
 0x306   :  { %v702_v36 = vmul.f32 0.2, %v657_v32  ;;  %v703_v37 = vmul.f32 0.2, %v686_v33 }
 0x308   :  { %v718_v44 = vmax.f32 %v657_v32, %v702_v36  ;;  %v719_v45 = vmax.f32 %v686_v33, %v703_v37 }
 0x30b   :  { %v658_v34 = vpop.f32.mrf.mxu0  ;;  %v687_v35 = vpop.f32.mrf.mxu1 }
 0x30c   :  { %v659_v38 = vadd.f32 %v658_v34, %v1830_v40  ;;  %v688_v39 = vadd.f32 %v687_v35, %v1832_v41  ;;  %v750_v40 = vld [vmem:[%s1896_s12] sm:$0x3]  ;;  %s1466_s12 = smov [#allocation8]  }
 0x30d   :  { %v1861_v50 = vperm.slane %v750_v40, 1  ;;  %v1864_v53 = vperm.slane %v750_v40, 0  ;;  %s1005_s9 = sshll.u32 %s1466_s12, 4  ;;  %s1006_s9 = int_to_ptr.vmem [resolvable:$true] %s1005_s9 }
 0x30e   :  { %v704_v42 = vmul.f32 0.2, %v659_v38  ;;  %v705_v43 = vmul.f32 0.2, %v688_v39 }
 0x310   :  { %v720_v46 = vmax.f32 %v659_v38, %v704_v42  ;;  %v721_v47 = vmax.f32 %v688_v39, %v705_v43 }
 0x312   :  { %v728_v48 = vpack.c.bf16 %v720_v46, %v718_v44  ;;  %v729_v49 = vpack.c.bf16 %v721_v47, %v719_v45 }
 0x314   :  { %892 = vmatmul.bf16.gmra.mxu2 %v728_v48  ;;  %1272 = vmatmul.msk.bf16.gmra.mxu3 %vm856_vm1, %v729_v49 }
 0x315   :  { %950 = vmatmul.bf16.gmra.mxu0 %v728_v48  ;;  %1276 = vmatmul.msk.bf16.gmra.mxu1 %vm856_vm1, %v729_v49 }
 0x362   :  { %v936_v41 = vpop.f32.mrf.mxu0  ;;  %v965_v51 = vpop.f32.mrf.mxu1 }
 0x363   :  { %v937_v52 = vadd.f32 %v936_v41, %v1861_v50 }
 0x365   :  { %v966_v54 = vadd.f32 %v965_v51, %v937_v52 }
 0x367   :  { %986 = vst [vmem:[#allocation8 + $0x8] sm:$0xff] %v966_v54  ;;  %v878_v55 = vpop.f32.mrf.mxu2  ;;  %v907_v56 = vpop.f32.mrf.mxu3 }
 0x368   :  { %v879_v57 = vadd.f32 %v878_v55, %v1864_v53 }
 0x36a   :  { %v908_v58 = vadd.f32 %v907_v56, %v879_v57  ;;  %v938_v59 = vpop.f32.mrf.mxu0  ;;  %v967_v60 = vpop.f32.mrf.mxu1 }
 0x36b   :  { %v939_v61 = vadd.f32 %v938_v59, %v1861_v50 }
 0x36c   :  { %985 = vst [vmem:[#allocation8] sm:$0xff] %v908_v58 }
 0x36d   :  { %v968_v62 = vadd.f32 %v967_v60, %v939_v61 }
 0x36f   :  { %988 = vst [vmem:[#allocation8 + $0x18] sm:$0xff] %v968_v62  ;;  %v880_v63 = vpop.f32.mrf.mxu2  ;;  %v909_v0 = vpop.f32.mrf.mxu3 }
 0x370   :  { %v881_v1 = vadd.f32 %v880_v63, %v1864_v53 }
 0x372   :  { %v910_v2 = vadd.f32 %v909_v0, %v881_v1  ;;  %v941_v3 = vpop.f32.mrf.mxu0  ;;  %v970_v4 = vpop.f32.mrf.mxu1 }
 0x373   :  { %v942_v6 = vadd.f32 %v941_v3, %v1861_v50 }
 0x374   :  { %987 = vst [vmem:[#allocation8 + $0x10] sm:$0xff] %v910_v2 }
 0x375   :  { %v971_v7 = vadd.f32 %v970_v4, %v942_v6 }
 0x377   :  { %990 = vst [vmem:[#allocation8 + $0x28] sm:$0xff] %v971_v7  ;;  %v883_v8 = vpop.f32.mrf.mxu2  ;;  %v912_v9 = vpop.f32.mrf.mxu3 }
 0x378   :  { %v884_v10 = vadd.f32 %v883_v8, %v1864_v53 }
 0x37a   :  { %v913_v11 = vadd.f32 %v912_v9, %v884_v10  ;;  %v943_v12 = vpop.f32.mrf.mxu0  ;;  %v972_v13 = vpop.f32.mrf.mxu1 }
 0x37b   :  { %v944_v14 = vadd.f32 %v943_v12, %v1861_v50 }
 0x37c   :  { %989 = vst [vmem:[#allocation8 + $0x20] sm:$0xff] %v913_v11 }
 0x37d   :  { %v973_v15 = vadd.f32 %v972_v13, %v944_v14 }
 0x37f   :  { %992 = vst [vmem:[#allocation8 + $0x38] sm:$0xff] %v973_v15  ;;  %v885_v16 = vpop.f32.mrf.mxu2  ;;  %v914_v17 = vpop.f32.mrf.mxu3 }
 0x380   :  { %v886_v18 = vadd.f32 %v885_v16, %v1864_v53 }
 0x382   :  { %v915_v19 = vadd.f32 %v914_v17, %v886_v18  ;;  %v946_v20 = vpop.f32.mrf.mxu0  ;;  %v975_v21 = vpop.f32.mrf.mxu1 }
 0x383   :  { %v947_v22 = vadd.f32 %v946_v20, %v1861_v50 }
 0x384   :  { %991 = vst [vmem:[#allocation8 + $0x30] sm:$0xff] %v915_v19 }
 0x385   :  { %v976_v23 = vadd.f32 %v975_v21, %v947_v22 }
 0x387   :  { %994 = vst [vmem:[#allocation8 + $0x48] sm:$0xff] %v976_v23  ;;  %v888_v24 = vpop.f32.mrf.mxu2  ;;  %v917_v25 = vpop.f32.mrf.mxu3 }
 0x388   :  { %v889_v26 = vadd.f32 %v888_v24, %v1864_v53 }
 0x38a   :  { %v918_v27 = vadd.f32 %v917_v25, %v889_v26  ;;  %v948_v28 = vpop.f32.mrf.mxu0  ;;  %v977_v5 = vpop.f32.mrf.mxu1 }
 0x38b   :  { %v949_v29 = vadd.f32 %v948_v28, %v1861_v50 }
 0x38c   :  { %993 = vst [vmem:[#allocation8 + $0x40] sm:$0xff] %v918_v27 }
 0x38d   :  { %v978_v30 = vadd.f32 %v977_v5, %v949_v29 }
 0x38f   :  { %996 = vst [vmem:[#allocation8 + $0x58] sm:$0xff] %v978_v30  ;;  %v890_v31 = vpop.f32.mrf.mxu2  ;;  %v919_v32 = vpop.f32.mrf.mxu3 }
 0x390   :  { %v891_v33 = vadd.f32 %v890_v31, %v1864_v53 }
 0x392   :  { %v920_v34 = vadd.f32 %v919_v32, %v891_v33  ;;  %v951_v35 = vpop.f32.mrf.mxu0  ;;  %v980_v36 = vpop.f32.mrf.mxu1 }
 0x393   :  { %v952_v37 = vadd.f32 %v951_v35, %v1861_v50 }
 0x394   :  { %995 = vst [vmem:[#allocation8 + $0x50] sm:$0xff] %v920_v34 }
 0x395   :  { %v981_v38 = vadd.f32 %v980_v36, %v952_v37 }
 0x397   :  { %998 = vst [vmem:[#allocation8 + $0x68] sm:$0xff] %v981_v38  ;;  %v893_v39 = vpop.f32.mrf.mxu2  ;;  %v922_v42 = vpop.f32.mrf.mxu3 }
 0x398   :  { %v894_v43 = vadd.f32 %v893_v39, %v1864_v53 }
 0x39a   :  { %v923_v44 = vadd.f32 %v922_v42, %v894_v43  ;;  %v953_v45 = vpop.f32.mrf.mxu0  ;;  %v982_v47 = vpop.f32.mrf.mxu1 }
 0x39b   :  { %v954_v46 = vadd.f32 %v953_v45, %v1861_v50 }
 0x39c   :  { %997 = vst [vmem:[#allocation8 + $0x60] sm:$0xff] %v923_v44 }
 0x39d   :  { %v983_v48 = vadd.f32 %v982_v47, %v954_v46 }
 0x39f   :  { %1000 = vst [vmem:[#allocation8 + $0x78] sm:$0xff] %v983_v48  ;;  %v895_v49 = vpop.f32.mrf.mxu2  ;;  %v924_v41 = vpop.f32.mrf.mxu3 }
 0x3a0   :  { %v896_v40 = vadd.f32 %v895_v49, %v1864_v53 }
 0x3a2   :  { %v925_v51 = vadd.f32 %v924_v41, %v896_v40 }
 0x3a4   :  { %999 = vst [vmem:[#allocation8 + $0x70] sm:$0xff] %v925_v51 }
 0x3a5   :  { %1013 = dma.vmem_to_hbm [thread:$0]  %s1006_s9, 2048, %s1008_s21, [#allocation4], %s1467_s0, %s1467_s0, %s1468_s22  }
 0x3a6   :  { %1459 = dma.done.wait [#allocation4], 2048  }
 0x3a7   :  { %1460 = vsyncadd [#allocation4], 4294965248 }
 0x3a8   :  { %1018 = vsyncpa [#allocation3], 1 }
 0x3a9   :  { %1019 = vsyncpa [#allocation6], 1 }
 0x3aa   :  { %1020 = vsyncpa [#allocation4], 1 }

</bundles_post_ra>
